<compile_context>
chip_gen: v5e
topology: v5e:2x2
jax: 0.10.0
libtpu: 0.0.40
codegen_flags: <defaults>
</compile_context>

<pallas_src>
import jax
import jax.numpy as jnp
from jax.experimental import pallas as pl
from jax.experimental.pallas import tpu as pltpu

LANE = 128  # TPU vreg lane width


def _round_up(x, m):
    return (x + m - 1) // m * m


def autoencoder_kernel(x_ref, w1_ref, b1_ref, w23_ref, b23_ref, w4_ref, b4_ref,
                       out_ref):
    """Fused autoencoder forward for one batch-major batch tile.

    x_ref   : (TB, 54) f32 input rows (DMA'd directly from the caller's array)
    w*_ref  : (in, out) weights in the MXU compute dtype, VMEM-resident
    b*_ref  : (1, out) f32 row biases
    out_ref : (TB, 54) output tile (f32 by default, bf16 optional)
    """
    cdt = w1_ref.dtype                            # MXU input dtype (bf16 or f32)
    x = x_ref[...].astype(cdt)                    # cast in-kernel: no extra HBM pass

    # encoder Linear(54 -> 32) + ReLU
    h = jnp.dot(x, w1_ref[...], preferred_element_type=jnp.float32)
    h = jnp.maximum(h + b1_ref[...], 0.0)         # (TB, 32), f32

    # folded Linear(32 -> 9) . Linear(9 -> 32)  (exact: no activation between)
    d = jnp.dot(h.astype(cdt), w23_ref[...], preferred_element_type=jnp.float32)
    d = jnp.maximum(d + b23_ref[...], 0.0)        # (TB, 32), f32

    # decoder Linear(32 -> 54) + Tanh
    y = jnp.dot(d.astype(cdt), w4_ref[...], preferred_element_type=jnp.float32)
    out_ref[...] = jnp.tanh(y + b4_ref[...]).astype(out_ref.dtype)


def autoencoder_forward(x, params, *, block_rows=4096, use_bf16=True,
                        out_dtype=jnp.float32):
    """x: (B, 54) float32, PyTorch batch-major convention. Returns (B, 54)."""
    B, F = x.shape
    assert F == 54
    cdt = jnp.bfloat16 if use_bf16 else jnp.float32

    # ---- wrapper-side weight prep (tiny tensors only; no whole-x passes) -----
    w1, b1 = params["w1"], params["b1"]          # (54,32), (1,32)
    w2, b2 = params["w2"], params["b2"]          # (32, 9), (1, 9)
    w3, b3 = params["w3"], params["b3"]          # ( 9,32), (1,32)
    w4, b4 = params["w4"], params["b4"]          # (32,54), (1,54)

    w23 = w2 @ w3                                # (32,32)  exact fold (f32)
    b23 = b2 @ w3 + b3                           # (1, 32)

    w1c = w1.astype(cdt)                         # (54, 32)
    w23c = w23.astype(cdt)                       # (32, 32)
    w4c = w4.astype(cdt)                         # (32, 54)
    b1f = b1.astype(jnp.float32)                 # (1, 32)
    b23f = b23.astype(jnp.float32)               # (1, 32)
    b4f = b4.astype(jnp.float32)                 # (1, 54)

    # ---- batch tiling ---------------------------------------------------------
    # Large tiles amortize the ~0.35 us per-grid-step cost; at least 2 tiles
    # (when B allows) so v7x can shard the parallel axis over its 2 TensorCores.
    if B <= 2 * LANE:
        tb = B                                   # single full-array block
    else:
        tb = min(_round_up(block_rows, LANE),
                 _round_up(pl.cdiv(B, 2), LANE))
    grid = (pl.cdiv(B, tb),)                     # ragged last block handled by Pallas

    const = lambda i: (0, 0)                     # weights/biases pinned in VMEM

    out = pl.pallas_call(
        autoencoder_kernel,
        out_shape=jax.ShapeDtypeStruct((B, F), out_dtype),
        grid=grid,
        in_specs=[
            pl.BlockSpec((tb, F), lambda i: (i, 0)),   # x tile (batch-sliced, contiguous rows)
            pl.BlockSpec(w1c.shape, const),
            pl.BlockSpec(b1f.shape, const),
            pl.BlockSpec(w23c.shape, const),
            pl.BlockSpec(b23f.shape, const),
            pl.BlockSpec(w4c.shape, const),
            pl.BlockSpec(b4f.shape, const),
        ],
        out_specs=pl.BlockSpec((tb, F), lambda i: (i, 0)),
        compiler_params=pltpu.CompilerParams(
            dimension_semantics=("parallel",)),  # batch tiles independent -> megacore
    )(x, w1c, b1f, w23c, b23f, w4c, b4f)
    return out


def init_params(key):
    """Deterministic synthetic init (nn.Linear shapes, stored (in, out))."""
    ks = jax.random.split(key, 8)

    def lin(kw, kb, fan_in, fan_out):
        bound = 1.0 / jnp.sqrt(fan_in)
        w = jax.random.uniform(kw, (fan_in, fan_out), jnp.float32, -bound, bound)
        b = jax.random.uniform(kb, (1, fan_out), jnp.float32, -bound, bound)
        return w, b

    w1, b1 = lin(ks[0], ks[1], 54, 32)   # encoder Linear(54, 32)
    w2, b2 = lin(ks[2], ks[3], 32, 9)    # encoder Linear(32, 9)
    w3, b3 = lin(ks[4], ks[5], 9, 32)    # decoder Linear(9, 32)
    w4, b4 = lin(ks[6], ks[7], 32, 54)   # decoder Linear(32, 54)
    return dict(w1=w1, b1=b1, w2=w2, b2=b2, w3=w3, b3=b3, w4=w4, b4=b4)


def reference_forward(x, p):
    h = jnp.maximum(x @ p["w1"] + p["b1"], 0.0)
    z = h @ p["w2"] + p["b2"]
    d = jnp.maximum(z @ p["w3"] + p["b3"], 0.0)
    return jnp.tanh(d @ p["w4"] + p["b4"])


if __name__ == "__main__":
    key = jax.random.PRNGKey(0)
    kx, kp, kx2 = jax.random.split(key, 3)
    params = init_params(kp)

    # Small batch: single full-array block path.
    x_small = jax.random.normal(kx, (8, 54), dtype=jnp.float32)
    ref_small = reference_forward(x_small, params)

    out_f32 = jax.block_until_ready(
        autoencoder_forward(x_small, params, use_bf16=False))
    assert out_f32.shape == (8, 54)
    # tolerance covers MXU default-precision / fold-reassociation differences
    assert jnp.allclose(out_f32, ref_small, atol=2e-2, rtol=2e-2)

    out_bf16 = jax.block_until_ready(
        autoencoder_forward(x_small, params, use_bf16=True))
    # bf16 path quantizes activations between layers as well as weights.
    assert jnp.allclose(out_bf16, ref_small, atol=5e-2, rtol=5e-2)

    # Tiled path, default tile selection: B=1000 -> tb=512, 2 tiles (ragged last).
    x_big = jax.random.normal(kx2, (1000, 54), dtype=jnp.float32)
    ref_big = reference_forward(x_big, params)
    out_big = jax.block_until_ready(autoencoder_forward(x_big, params))
    assert out_big.shape == (1000, 54)
    assert jnp.allclose(out_big, ref_big, atol=5e-2, rtol=5e-2)

    # Forced multi-tile ragged grid: tb=256 -> 4 tiles, last block 232 valid rows.
    out_big4 = jax.block_until_ready(
        autoencoder_forward(x_big, params, block_rows=256))
    assert jnp.allclose(out_big4, ref_big, atol=5e-2, rtol=5e-2)

    # Optional bf16 output (halves the output HBM stream if downstream allows).
    out_big_bf16 = jax.block_until_ready(
        autoencoder_forward(x_big, params, out_dtype=jnp.bfloat16))
    assert out_big_bf16.dtype == jnp.bfloat16
    assert jnp.allclose(out_big_bf16.astype(jnp.float32), ref_big,
                        atol=6e-2, rtol=6e-2)

    print("KERNEL_OK")
</pallas_src>

<mosaic_0001>
module attributes {stable_mosaic.version = 11 : i64} {
  func.func @autoencoder_kernel(%arg0: i32, %arg1: memref<8x54xf32, #tpu.memory_space<vmem>>, %arg2: memref<54x32xf32, #tpu.memory_space<vmem>>, %arg3: memref<1x32xf32, #tpu.memory_space<vmem>>, %arg4: memref<32x32xf32, #tpu.memory_space<vmem>>, %arg5: memref<1x32xf32, #tpu.memory_space<vmem>>, %arg6: memref<32x54xf32, #tpu.memory_space<vmem>>, %arg7: memref<1x54xf32, #tpu.memory_space<vmem>>, %arg8: memref<8x54xf32, #tpu.memory_space<vmem>>) attributes {dimension_semantics = [#tpu.dimension_semantics<parallel>], iteration_bounds = array<i64: 1>, scalar_prefetch = 0 : i64, scratch_operands = 0 : i64, tpu.core_type = #tpu.core_type<tc>, window_params = [{transform_indices = @transform_0, window_bounds = array<i64: 8, 54>}, {pipeline_mode = #tpu.pipeline_mode<synchronous>, transform_indices = @transform_1, window_bounds = array<i64: 54, 32>}, {pipeline_mode = #tpu.pipeline_mode<synchronous>, transform_indices = @transform_2, window_bounds = array<i64: 1, 32>}, {pipeline_mode = #tpu.pipeline_mode<synchronous>, transform_indices = @transform_3, window_bounds = array<i64: 32, 32>}, {pipeline_mode = #tpu.pipeline_mode<synchronous>, transform_indices = @transform_4, window_bounds = array<i64: 1, 32>}, {pipeline_mode = #tpu.pipeline_mode<synchronous>, transform_indices = @transform_5, window_bounds = array<i64: 32, 54>}, {pipeline_mode = #tpu.pipeline_mode<synchronous>, transform_indices = @transform_6, window_bounds = array<i64: 1, 54>}, {transform_indices = @transform_7, window_bounds = array<i64: 8, 54>}]} {
    %c0 = arith.constant 0 : index
    %c0_0 = arith.constant 0 : index
    %0 = vector.load %arg1[%c0, %c0_0] : memref<8x54xf32, #tpu.memory_space<vmem>>, vector<8x54xf32>
    %c0_1 = arith.constant 0 : index
    %c0_2 = arith.constant 0 : index
    %1 = vector.load %arg2[%c0_1, %c0_2] : memref<54x32xf32, #tpu.memory_space<vmem>>, vector<54x32xf32>
    %cst = arith.constant dense<0.000000e+00> : vector<8x32xf32>
    %2 = tpu.matmul %0, %1, %cst {dimension_numbers = #tpu.dot_dimension_numbers<[1], [0], [0], [1], [0, 0, 1, 1], [], []>} : vector<8x54xf32>, vector<54x32xf32>, vector<8x32xf32> -> vector<8x32xf32>
    %c0_3 = arith.constant 0 : index
    %c0_4 = arith.constant 0 : index
    %3 = vector.load %arg3[%c0_3, %c0_4] : memref<1x32xf32, #tpu.memory_space<vmem>>, vector<1x32xf32>
    %4 = vector.broadcast %3 : vector<1x32xf32> to vector<8x32xf32>
    %5 = arith.addf %2, %4 : vector<8x32xf32>
    %cst_5 = arith.constant 0.000000e+00 : f32
    %6 = vector.broadcast %cst_5 : f32 to vector<8x32xf32>
    %7 = arith.maximumf %5, %6 : vector<8x32xf32>
    %c0_6 = arith.constant 0 : index
    %c0_7 = arith.constant 0 : index
    %8 = vector.load %arg4[%c0_6, %c0_7] : memref<32x32xf32, #tpu.memory_space<vmem>>, vector<32x32xf32>
    %cst_8 = arith.constant dense<0.000000e+00> : vector<8x32xf32>
    %9 = tpu.matmul %7, %8, %cst_8 {dimension_numbers = #tpu.dot_dimension_numbers<[1], [0], [0], [1], [0, 0, 1, 1], [], []>} : vector<8x32xf32>, vector<32x32xf32>, vector<8x32xf32> -> vector<8x32xf32>
    %c0_9 = arith.constant 0 : index
    %c0_10 = arith.constant 0 : index
    %10 = vector.load %arg5[%c0_9, %c0_10] : memref<1x32xf32, #tpu.memory_space<vmem>>, vector<1x32xf32>
    %11 = vector.broadcast %10 : vector<1x32xf32> to vector<8x32xf32>
    %12 = arith.addf %9, %11 : vector<8x32xf32>
    %cst_11 = arith.constant 0.000000e+00 : f32
    %13 = vector.broadcast %cst_11 : f32 to vector<8x32xf32>
    %14 = arith.maximumf %12, %13 : vector<8x32xf32>
    %c0_12 = arith.constant 0 : index
    %c0_13 = arith.constant 0 : index
    %15 = vector.load %arg6[%c0_12, %c0_13] : memref<32x54xf32, #tpu.memory_space<vmem>>, vector<32x54xf32>
    %cst_14 = arith.constant dense<0.000000e+00> : vector<8x54xf32>
    %16 = tpu.matmul %14, %15, %cst_14 {dimension_numbers = #tpu.dot_dimension_numbers<[1], [0], [0], [1], [0, 0, 1, 1], [], []>} : vector<8x32xf32>, vector<32x54xf32>, vector<8x54xf32> -> vector<8x54xf32>
    %c0_15 = arith.constant 0 : index
    %c0_16 = arith.constant 0 : index
    %17 = vector.load %arg7[%c0_15, %c0_16] : memref<1x54xf32, #tpu.memory_space<vmem>>, vector<1x54xf32>
    %18 = vector.broadcast %17 : vector<1x54xf32> to vector<8x54xf32>
    %19 = arith.addf %16, %18 : vector<8x54xf32>
    %20 = math.tanh %19 : vector<8x54xf32>
    %c0_17 = arith.constant 0 : index
    %c0_18 = arith.constant 0 : index
    %21 = vector.load %arg8[%c0_17, %c0_18] : memref<8x54xf32, #tpu.memory_space<vmem>>, vector<8x54xf32>
    tpu.vector_store %arg8[%c0_17, %c0_18], %20 {strides = array<i32>} : memref<8x54xf32, #tpu.memory_space<vmem>>, vector<8x54xf32>,
    return
  }
  func.func @transform_0(%arg0: i32) -> (i32, i32) {
    %c0_i32 = arith.constant 0 : i32
    %c0_i32_0 = arith.constant 0 : i32
    return %arg0, %c0_i32 : i32, i32
  }
  func.func @transform_1(%arg0: i32) -> (i32, i32) {
    %c0_i32 = arith.constant 0 : i32
    %c0_i32_0 = arith.constant 0 : i32
    %c0_i32_1 = arith.constant 0 : i32
    return %c0_i32, %c0_i32_0 : i32, i32
  }
  func.func @transform_2(%arg0: i32) -> (i32, i32) {
    %c0_i32 = arith.constant 0 : i32
    %c0_i32_0 = arith.constant 0 : i32
    %c0_i32_1 = arith.constant 0 : i32
    return %c0_i32, %c0_i32_0 : i32, i32
  }
  func.func @transform_3(%arg0: i32) -> (i32, i32) {
    %c0_i32 = arith.constant 0 : i32
    %c0_i32_0 = arith.constant 0 : i32
    %c0_i32_1 = arith.constant 0 : i32
    return %c0_i32, %c0_i32_0 : i32, i32
  }
  func.func @transform_4(%arg0: i32) -> (i32, i32) {
    %c0_i32 = arith.constant 0 : i32
    %c0_i32_0 = arith.constant 0 : i32
    %c0_i32_1 = arith.constant 0 : i32
    return %c0_i32, %c0_i32_0 : i32, i32
  }
  func.func @transform_5(%arg0: i32) -> (i32, i32) {
    %c0_i32 = arith.constant 0 : i32
    %c0_i32_0 = arith.constant 0 : i32
    %c0_i32_1 = arith.constant 0 : i32
    return %c0_i32, %c0_i32_0 : i32, i32
  }
  func.func @transform_6(%arg0: i32) -> (i32, i32) {
    %c0_i32 = arith.constant 0 : i32
    %c0_i32_0 = arith.constant 0 : i32
    %c0_i32_1 = arith.constant 0 : i32
    return %c0_i32, %c0_i32_0 : i32, i32
  }
  func.func @transform_7(%arg0: i32) -> (i32, i32) {
    %c0_i32 = arith.constant 0 : i32
    %c0_i32_0 = arith.constant 0 : i32
    return %arg0, %c0_i32 : i32, i32
  }
}

</mosaic_0001>

<bundles_post_ra>
// kernel: tpu_custom_call.1
= control target key start
LH: loop header
LB: loop body
LE: loop exit
PB: predicated region body
PF: predicated region fallthrough
CT: control target
= control target key end

     0   :  { %vm43_vm0 = vcmask 1045504   ;;  %s289_s0 = inlined_call_operand.vmem [shape: f32[8,54], index: 0, kind: input, shape index: {}]   ;;  %s290_s1 = inlined_call_operand.vmem [shape: f32[54,32], index: 1, kind: input, shape index: {}]   ;;  %s291_s2 = inlined_call_operand.vmem [shape: f32[1,32], index: 2, kind: input, shape index: {}]   ;;  %s292_s3 = inlined_call_operand.vmem [shape: f32[32,32], index: 3, kind: input, shape index: {}]   ;;  %s293_s4 = inlined_call_operand.vmem [shape: f32[1,32], index: 4, kind: input, shape index: {}]   ;;  %s294_s5 = inlined_call_operand.vmem [shape: f32[32,54], index: 5, kind: input, shape index: {}]   ;;  %s295_s6 = inlined_call_operand.vmem [shape: f32[1,54], index: 6, kind: input, shape index: {}]   ;;  %s296_s7 = inlined_call_operand.hbm [shape: f32[8,54], index: 7, kind: output, shape index: {}]  }
   0x1   :  { %v34_v0 = vld [vmem:[%s290_s1 + $0x30] sm:$0x3f]  ;;  %v33_v1 = vld [vmem:[%s290_s1 + $0x28] sm:$0xff]  ;;  %v32_v2 = vld [vmem:[%s290_s1 + $0x20] sm:$0xff] }
   0x2   :  { %150 = vmatpush.msk.msra.mxu0 %vm43_vm0, %v34_v0  ;;  %v71_v3 = vld [vmem:[%s292_s3 + $0x18] sm:$0xff] }
   0x3   :  { %92 = vmatpush.msra.mxu1 %v71_v3  ;;  %v31_v4 = vld [vmem:[%s290_s1 + $0x18] sm:$0xff] }
   0x4   :  { %57 = vmatpush.msra.mxu0 %v33_v1 }
   0x5   :  { %12 = vsyncpa [#allocation3], 0  ;;  %v30_v5 = vld [vmem:[%s290_s1 + $0x10] sm:$0xff]  ;;  %v29_v6 = vld [vmem:[%s290_s1 + $0x8] sm:$0xff]  ;;  %vm39_vm1 = vcmask 441344   ;;  %vm76_vm2 = vcmask 261120  }
   0x6   :  { %58 = vmatpush.msra.mxu0 %v32_v2  ;;  %v28_v7 = vld [vmem:[%s290_s1] sm:$0xff]  ;;  %v70_v9 = vld [vmem:[%s292_s3 + $0x10] sm:$0xff]  ;;  %v69_v10 = vld [vmem:[%s292_s3 + $0x8] sm:$0xff]  ;;  %s186_s12 = smov [#allocation2]   ;;  %s141_s15 = sshll.u32 %s296_s7, 4  ;;  %s142_s15 = int_to_ptr.hbm [resolvable:$true] %s141_s15 }
   0x7   :  { %v27_v8 = vld [vmem:[%s289_s0] sm:$0xff]  ;;  %93 = vmatpush.msra.mxu1 %v70_v9  ;;  %v104_v12 = vld [vmem:[%s294_s5 + $0x18] sm:$0xff]  ;;  %v103_v17 = vld [vmem:[%s294_s5 + $0x10] sm:$0xff]  ;;  %s139_s13 = sshll.u32 %s186_s12, 4  ;;  %s140_s13 = int_to_ptr.vmem [resolvable:$true] %s139_s13 }
   0x8   :  { %59 = vmatpush.msra.mxu0 %v31_v4  ;;  %v68_v11 = vld [vmem:[%s292_s3] sm:$0xff]  ;;  %124 = vmatpush.msra.mxu2 %v104_v12  ;;  %v102_v18 = vld [vmem:[%s294_s5 + $0x8] sm:$0xff] }
   0x9   :  { %94 = vmatpush.msra.mxu1 %v69_v10  ;;  %v155_v13 = vld [vmem:[%s291_s2] ss:$0 sm:$0xff] }
   0xa   :  { %60 = vmatpush.msra.mxu0 %v30_v5  ;;  %125 = vmatpush.msra.mxu2 %v103_v17  ;;  %v101_v19 = vld [vmem:[%s294_s5] sm:$0xff] }
   0xb   :  { %95 = vmatpush.msra.mxu1 %v68_v11  ;;  %v156_v20 = vld [vmem:[%s293_s4] ss:$0 sm:$0xff] }
   0xc   :  { %61 = vmatpush.msra.mxu0 %v29_v6  ;;  %126 = vmatpush.msra.mxu2 %v102_v18  ;;  %v157_v24 = vld [vmem:[%s295_s6] ss:$0 sm:$0xff] }
   0xe   :  { %62 = vmatpush.msra.mxu0 %v28_v7  ;;  %127 = vmatpush.msra.mxu2 %v101_v19 }
   0xf   :  { %151 = vmatmul.msk.f32.vlgmr.msra.gmra.mxu0 %vm39_vm1, %v27_v8 }
  0x8c   :  { %v64_v14 = vpop.f32.mrf.mxu0 }
  0x8d   :  { %v65_v15 = vadd.f32 %v155_v13, %v64_v14 }
  0x8f   :  { %v67_v16 = vmax.f32 %v65_v15, 0.0 }
  0x91   :  { %152 = vmatmul.msk.f32.vlgmr.msra.gmra.mxu1 %vm76_vm2, %v67_v16 }
 0x10e   :  { %v97_v21 = vpop.f32.mrf.mxu1 }
 0x10f   :  { %v98_v22 = vadd.f32 %v156_v20, %v97_v21 }
 0x111   :  { %v100_v23 = vmax.f32 %v98_v22, 0.0 }
 0x113   :  { %153 = vmatmul.msk.f32.vlgmr.msra.gmra.mxu2 %vm76_vm2, %v100_v23 }
 0x196   :  { %v129_v25 = vpop.f32.mrf.mxu2 }
 0x197   :  { %v130_v26 = vadd.f32 %v157_v24, %v129_v25 }
 0x199   :  { %158 = vtanh.f32 %v130_v26 }
 0x19f   :  { %v159_v27 = vpop.eup %158 }
 0x1a0   :  { %133 = vst.msk [vmem:[#allocation2] sm:$0xff] %vm39_vm1, %v159_v27 }
 0x1a1   :  { %144 = dma.vmem_to_hbm [thread:$0]  %s140_s13, 128, %s142_s15, [#allocation3]  }
 0x1a2   :  { %184 = dma.done.wait [#allocation3], 128  }
 0x1a3   :  { %185 = vsyncadd [#allocation3], 4294967168 }
 0x1a4   :  { %149 = vsyncpa [#allocation3], 1 }

</bundles_post_ra>
